<compile_context>
chip_gen: v7x
topology: tpu7x:2x2x1
jax: 0.10.0
libtpu: 0.0.40
codegen_flags: <defaults>
</compile_context>

<pallas_src>
import functools

import jax
import jax.numpy as jnp
from jax.experimental import pallas as pl
from jax.experimental.pallas import tpu as pltpu


def _round_up(x: int, m: int) -> int:
    return ((x + m - 1) // m) * m


def simple_nn_kernel(x_ref, w1_ref, b1_ref, w2_ref, b2_ref, o_ref):
    # fc1 + ReLU  (MXU matmul, f32 accumulate; bias broadcasts over batch rows)
    h = jnp.dot(x_ref[...], w1_ref[...], preferred_element_type=jnp.float32)
    h = jnp.maximum(h + b1_ref[...], 0.0)

    # fc2 (N is lane-dense: padded to a multiple of 128)
    logits = jnp.dot(h, w2_ref[...], preferred_element_type=jnp.float32)
    logits = logits + b2_ref[...]

    # LogSoftmax over the class (last) axis. Padded classes carry a -1e30 bias,
    # so exp(shifted) -> 0 for them and they do not perturb the log-sum-exp.
    # max/sum go to the XLU and exp to the EUP, so this epilogue hides under
    # the MXU work at larger batch tiles.
    m = jnp.max(logits, axis=-1, keepdims=True)
    shifted = logits - m
    lse = jnp.log(jnp.sum(jnp.exp(shifted), axis=-1, keepdims=True))
    o_ref[...] = (shifted - lse).astype(o_ref.dtype)


@functools.partial(jax.jit, static_argnames=("block_batch",))
def simple_nn_forward(x, w1, b1, w2, b2, *, block_batch: int = 512):
    """x: [B, input_size]; w1: [input_size, 128]; b1: [128];
       w2: [128, num_classes]; b2: [num_classes].  Returns [B, num_classes]."""
    B, in_size = x.shape
    hidden = w1.shape[1]
    num_classes = w2.shape[1]

    # ---- lane-dense class padding (multiple of 128) ------------------------
    C_pad = _round_up(max(num_classes, 128), 128)
    w2_p = jnp.zeros((hidden, C_pad), dtype=w2.dtype).at[:, :num_classes].set(w2)
    # Large negative bias on padded classes so they vanish under log-sum-exp.
    b2_p = jnp.full((1, C_pad), -1e30, dtype=jnp.float32).at[0, :num_classes].set(b2)
    b1_2d = b1.reshape(1, hidden)

    # ---- batch tiling -------------------------------------------------------
    # TB: sublane-aligned (multiple of 8) batch tile. 512 rows of f32 keeps the
    # per-step live VMEM tiny (x: 2x TB*in*4, out: 2x TB*128*4, weights ~80 KB)
    # and is well inside v7x's 64 MiB VMEM while amortizing per-step overhead.
    TB = min(block_batch, _round_up(B, 8))
    B_pad = _round_up(B, TB)
    if B_pad != B:
        x_p = jnp.zeros((B_pad, in_size), dtype=x.dtype).at[:B, :].set(x)
    else:
        x_p = x

    grid = (B_pad // TB,)

    out_padded = pl.pallas_call(
        simple_nn_kernel,
        out_shape=jax.ShapeDtypeStruct((B_pad, C_pad), jnp.float32),
        grid=grid,
        in_specs=[
            pl.BlockSpec((TB, in_size), lambda i: (i, 0)),       # x: tiled over batch
            pl.BlockSpec((in_size, hidden), lambda i: (0, 0)),   # w1: VMEM-resident
            pl.BlockSpec((1, hidden), lambda i: (0, 0)),         # b1
            pl.BlockSpec((hidden, C_pad), lambda i: (0, 0)),     # w2 (padded)
            pl.BlockSpec((1, C_pad), lambda i: (0, 0)),          # b2 (padded)
        ],
        out_specs=pl.BlockSpec((TB, C_pad), lambda i: (i, 0)),
        compiler_params=pltpu.CompilerParams(
            dimension_semantics=("parallel",)),
    )(x_p, w1, b1_2d, w2_p, b2_p)

    # Slice away batch padding and padded classes.
    return out_padded[:B, :num_classes]


def _reference(x, w1, b1, w2, b2):
    h = jnp.maximum(x @ w1 + b1, 0.0)
    return jax.nn.log_softmax(h @ w2 + b2, axis=1)


if __name__ == "__main__":
    input_size, hidden, num_classes = 32, 128, 10

    key = jax.random.PRNGKey(0)
    kx, kw1, kb1, kw2, kb2, kx2 = jax.random.split(key, 6)

    # PyTorch Linear stores weight as [out, in]; transpose to [in, out].
    w1 = (jax.random.normal(kw1, (hidden, input_size), dtype=jnp.float32) * 0.1).T
    b1 = jax.random.normal(kb1, (hidden,), dtype=jnp.float32) * 0.1
    w2 = (jax.random.normal(kw2, (num_classes, hidden), dtype=jnp.float32) * 0.1).T
    b2 = jax.random.normal(kb2, (num_classes,), dtype=jnp.float32) * 0.1

    # Case 1: tiny batch (single grid step, TB = 8).
    batch = 8
    x = jax.random.normal(kx, (batch, input_size), dtype=jnp.float32)
    out = jax.block_until_ready(simple_nn_forward(x, w1, b1, w2, b2))
    ref = _reference(x, w1, b1, w2, b2)
    assert out.shape == (batch, num_classes)
    assert jnp.allclose(out, ref, atol=1e-5, rtol=1e-5)

    # Case 2: batch larger than a tile (exercises batch tiling + batch padding).
    batch2 = 200
    x2 = jax.random.normal(kx2, (batch2, input_size), dtype=jnp.float32)
    out2 = jax.block_until_ready(
        simple_nn_forward(x2, w1, b1, w2, b2, block_batch=64))
    ref2 = _reference(x2, w1, b1, w2, b2)
    assert out2.shape == (batch2, num_classes)
    assert jnp.allclose(out2, ref2, atol=1e-5, rtol=1e-5)

    print("KERNEL_OK")
</pallas_src>

<mosaic_0001>
module attributes {stable_mosaic.version = 11 : i64} {
  func.func @simple_nn_kernel(%arg0: i32, %arg1: memref<8x32xf32, #tpu.memory_space<vmem>>, %arg2: memref<32x128xf32, #tpu.memory_space<vmem>>, %arg3: memref<1x128xf32, #tpu.memory_space<vmem>>, %arg4: memref<128x128xf32, #tpu.memory_space<vmem>>, %arg5: memref<1x128xf32, #tpu.memory_space<vmem>>, %arg6: memref<8x128xf32, #tpu.memory_space<vmem>>) attributes {dimension_semantics = [#tpu.dimension_semantics<parallel>], iteration_bounds = array<i64: 1>, scalar_prefetch = 0 : i64, scratch_operands = 0 : i64, tpu.core_type = #tpu.core_type<tc>, window_params = [{transform_indices = @transform_0, window_bounds = array<i64: 8, 32>}, {pipeline_mode = #tpu.pipeline_mode<synchronous>, transform_indices = @transform_1, window_bounds = array<i64: 32, 128>}, {pipeline_mode = #tpu.pipeline_mode<synchronous>, transform_indices = @transform_2, window_bounds = array<i64: 1, 128>}, {pipeline_mode = #tpu.pipeline_mode<synchronous>, transform_indices = @transform_3, window_bounds = array<i64: 128, 128>}, {pipeline_mode = #tpu.pipeline_mode<synchronous>, transform_indices = @transform_4, window_bounds = array<i64: 1, 128>}, {transform_indices = @transform_5, window_bounds = array<i64: 8, 128>}]} {
    %c0 = arith.constant 0 : index
    %c0_0 = arith.constant 0 : index
    %0 = vector.load %arg1[%c0, %c0_0] : memref<8x32xf32, #tpu.memory_space<vmem>>, vector<8x32xf32>
    %c0_1 = arith.constant 0 : index
    %c0_2 = arith.constant 0 : index
    %1 = vector.load %arg2[%c0_1, %c0_2] : memref<32x128xf32, #tpu.memory_space<vmem>>, vector<32x128xf32>
    %cst = arith.constant dense<0.000000e+00> : vector<8x128xf32>
    %2 = tpu.matmul %0, %1, %cst {dimension_numbers = #tpu.dot_dimension_numbers<[1], [0], [0], [1], [0, 0, 1, 1], [], []>} : vector<8x32xf32>, vector<32x128xf32>, vector<8x128xf32> -> vector<8x128xf32>
    %c0_3 = arith.constant 0 : index
    %c0_4 = arith.constant 0 : index
    %3 = vector.load %arg3[%c0_3, %c0_4] : memref<1x128xf32, #tpu.memory_space<vmem>>, vector<1x128xf32>
    %4 = vector.broadcast %3 : vector<1x128xf32> to vector<8x128xf32>
    %5 = arith.addf %2, %4 : vector<8x128xf32>
    %cst_5 = arith.constant 0.000000e+00 : f32
    %6 = vector.broadcast %cst_5 : f32 to vector<8x128xf32>
    %7 = arith.maximumf %5, %6 : vector<8x128xf32>
    %c0_6 = arith.constant 0 : index
    %c0_7 = arith.constant 0 : index
    %8 = vector.load %arg4[%c0_6, %c0_7] : memref<128x128xf32, #tpu.memory_space<vmem>>, vector<128x128xf32>
    %cst_8 = arith.constant dense<0.000000e+00> : vector<8x128xf32>
    %9 = tpu.matmul %7, %8, %cst_8 {dimension_numbers = #tpu.dot_dimension_numbers<[1], [0], [0], [1], [0, 0, 1, 1], [], []>} : vector<8x128xf32>, vector<128x128xf32>, vector<8x128xf32> -> vector<8x128xf32>
    %c0_9 = arith.constant 0 : index
    %c0_10 = arith.constant 0 : index
    %10 = vector.load %arg5[%c0_9, %c0_10] : memref<1x128xf32, #tpu.memory_space<vmem>>, vector<1x128xf32>
    %11 = vector.broadcast %10 : vector<1x128xf32> to vector<8x128xf32>
    %12 = arith.addf %9, %11 : vector<8x128xf32>
    %cst_11 = arith.constant dense<0xFF800000> : vector<8xf32>
    %13 = vector.multi_reduction <maximumf>, %12, %cst_11 [1] : vector<8x128xf32> to vector<8xf32>
    %14 = vector.shape_cast %13 : vector<8xf32> to vector<8x1xf32>
    %15 = vector.broadcast %14 : vector<8x1xf32> to vector<8x128xf32>
    %16 = arith.subf %12, %15 : vector<8x128xf32>
    %17 = math.exp %16 : vector<8x128xf32>
    %cst_12 = arith.constant dense<0.000000e+00> : vector<8xf32>
    %18 = vector.multi_reduction <add>, %17, %cst_12 [1] : vector<8x128xf32> to vector<8xf32>
    %19 = vector.shape_cast %18 : vector<8xf32> to vector<8x1xf32>
    %20 = math.log %19 : vector<8x1xf32>
    %21 = vector.broadcast %20 : vector<8x1xf32> to vector<8x128xf32>
    %22 = arith.subf %16, %21 : vector<8x128xf32>
    %c0_13 = arith.constant 0 : index
    %c0_14 = arith.constant 0 : index
    %23 = vector.load %arg6[%c0_13, %c0_14] : memref<8x128xf32, #tpu.memory_space<vmem>>, vector<8x128xf32>
    tpu.vector_store %arg6[%c0_13, %c0_14], %22 {strides = array<i32>} : memref<8x128xf32, #tpu.memory_space<vmem>>, vector<8x128xf32>,
    return
  }
  func.func @transform_0(%arg0: i32) -> (i32, i32) {
    %c0_i32 = arith.constant 0 : i32
    %c0_i32_0 = arith.constant 0 : i32
    return %arg0, %c0_i32 : i32, i32
  }
  func.func @transform_1(%arg0: i32) -> (i32, i32) {
    %c0_i32 = arith.constant 0 : i32
    %c0_i32_0 = arith.constant 0 : i32
    %c0_i32_1 = arith.constant 0 : i32
    return %c0_i32, %c0_i32_0 : i32, i32
  }
  func.func @transform_2(%arg0: i32) -> (i32, i32) {
    %c0_i32 = arith.constant 0 : i32
    %c0_i32_0 = arith.constant 0 : i32
    %c0_i32_1 = arith.constant 0 : i32
    return %c0_i32, %c0_i32_0 : i32, i32
  }
  func.func @transform_3(%arg0: i32) -> (i32, i32) {
    %c0_i32 = arith.constant 0 : i32
    %c0_i32_0 = arith.constant 0 : i32
    %c0_i32_1 = arith.constant 0 : i32
    return %c0_i32, %c0_i32_0 : i32, i32
  }
  func.func @transform_4(%arg0: i32) -> (i32, i32) {
    %c0_i32 = arith.constant 0 : i32
    %c0_i32_0 = arith.constant 0 : i32
    %c0_i32_1 = arith.constant 0 : i32
    return %c0_i32, %c0_i32_0 : i32, i32
  }
  func.func @transform_5(%arg0: i32) -> (i32, i32) {
    %c0_i32 = arith.constant 0 : i32
    %c0_i32_0 = arith.constant 0 : i32
    return %arg0, %c0_i32 : i32, i32
  }
}

</mosaic_0001>

<bundles_post_ra>
// kernel: simple_nn_forward.1
= control target key start
LH: loop header
LB: loop body
LE: loop exit
PB: predicated region body
PF: predicated region fallthrough
CT: control target
= control target key end

     0   :  { %v359_v3 = vmov 0.0|0.0   ;;  %vm360_vm0 = vmmov 0   ;;  %v361_v6 = vmov 0.0   ;;  %s474_s0 = inlined_call_operand.vmem [shape: f32[8,32], index: 0, kind: input, shape index: {}]   ;;  %s475_s1 = inlined_call_operand.vmem [shape: f32[32,128], index: 1, kind: input, shape index: {}]   ;;  %s476_s2 = inlined_call_operand.vmem [shape: f32[1,128], index: 2, kind: input, shape index: {}]   ;;  %s477_s3 = inlined_call_operand.vmem [shape: f32[128,128], index: 3, kind: input, shape index: {}]   ;;  %s478_s4 = inlined_call_operand.vmem [shape: f32[1,128], index: 4, kind: input, shape index: {}]   ;;  %s479_s5 = inlined_call_operand.hbm [shape: f32[8,128], index: 5, kind: output, shape index: {}]  }
   0x1   :  { %v22_v0 = vld [vmem:[%s475_s1] sm:$0xff]  ;;  %v23_v1 = vld [vmem:[%s475_s1 + $0x8] sm:$0xff]  ;;  %v24_v2 = vld [vmem:[%s475_s1 + $0x10] sm:$0xff]  ;;  %297 = vmatprep.subr.bf16.mxu0 %v359_v3  ;;  %259 = vmatprep.mubr.msk.f32.mxu0 %vm360_vm0, %v361_v6 }
   0x2   :  { %v298_v4 = vpack.c.bf16 %v23_v1, %v22_v0  ;;  %v25_v5 = vld [vmem:[%s475_s1 + $0x18] sm:$0xff]  ;;  %v108_v7 = vld [vmem:[%s477_s3] sm:$0xff]  ;;  %303 = vmatprep.subr.bf16.mxu1 %v359_v3  ;;  %v109_v8 = vld [vmem:[%s477_s3 + $0x8] sm:$0xff]  ;;  %294 = vmatprep.mubr.msk.f32.mxu1 %vm360_vm0, %v361_v6 }
   0x3   :  { %v110_v9 = vld [vmem:[%s477_s3 + $0x10] sm:$0xff]  ;;  %v111_v10 = vld [vmem:[%s477_s3 + $0x18] sm:$0xff]  ;;  %v301_v11 = vpack.c.bf16 %v25_v5, %v24_v2  ;;  %v304_v12 = vpack.c.bf16 %v109_v8, %v108_v7  ;;  %v112_v14 = vld [vmem:[%s477_s3 + $0x20] sm:$0xff] }
   0x4   :  { %299 = vmatpush3.bf16.msra.mxu0 %v298_v4  ;;  %v307_v13 = vpack.c.bf16 %v111_v10, %v110_v9  ;;  %v113_v15 = vld [vmem:[%s477_s3 + $0x28] sm:$0xff] }
   0x5   :  { %300 = vmatprep.subr.bf16.mxu0 %v359_v3  ;;  %305 = vmatpush3.bf16.msra.mxu1 %v304_v12 }
   0x6   :  { %306 = vmatprep.subr.bf16.mxu1 %v359_v3 }
   0x7   :  { %10 = vsyncpa [#allocation3], 0  ;;  %v21_v16 = vld [vmem:[%s474_s0] sm:$0xff]  ;;  %vm33_vm1 = vcmask 261120   ;;  %v310_v17 = vpack.c.bf16 %v113_v15, %v112_v14  ;;  %v114_v18 = vld [vmem:[%s477_s3 + $0x30] sm:$0xff] }
   0x8   :  { %302 = vmatpush3.bf16.msra.mxu0 %v301_v11  ;;  %v115_v19 = vld [vmem:[%s477_s3 + $0x38] sm:$0xff]  ;;  %v116_v21 = vld [vmem:[%s477_s3 + $0x40] sm:$0xff]  ;;  %v117_v22 = vld [vmem:[%s477_s3 + $0x48] sm:$0xff] }
   0x9   :  { %308 = vmatpush3.bf16.msra.mxu1 %v307_v13  ;;  %v313_v20 = vpack.c.bf16 %v115_v19, %v114_v18  ;;  %v316_v23 = vpack.c.bf16 %v117_v22, %v116_v21  ;;  %v118_v24 = vld [vmem:[%s477_s3 + $0x50] sm:$0xff]  ;;  %v119_v25 = vld [vmem:[%s477_s3 + $0x58] sm:$0xff]  ;;  %v120_v27 = vld [vmem:[%s477_s3 + $0x60] sm:$0xff] }
   0xa   :  { %309 = vmatprep.subr.bf16.mxu1 %v359_v3  ;;  %v319_v26 = vpack.c.bf16 %v119_v25, %v118_v24  ;;  %v121_v28 = vld [vmem:[%s477_s3 + $0x68] sm:$0xff]  ;;  %v122_v30 = vld [vmem:[%s477_s3 + $0x70] sm:$0xff]  ;;  %v123_v31 = vld [vmem:[%s477_s3 + $0x78] sm:$0xff] }
   0xb   :  { %260 = vmatmul.mubr.msk.f32.vlgmr.msra.gmra.mrb[0].mxu0 %vm33_vm1, %v21_v16  ;;  %v322_v29 = vpack.c.bf16 %v121_v28, %v120_v27  ;;  %v325_v32 = vpack.c.bf16 %v123_v31, %v122_v30  ;;  %v226_v33 = vld [vmem:[%s476_s2] ss:$0 sm:$0xff]  ;;  %s362_s2 = smov [#allocation2]  }
   0xc   :  { %v228_v38 = vld [vmem:[%s478_s4] ss:$0 sm:$0xff]  ;;  %s218_s3 = sshll.u32 %s362_s2, 4  ;;  %s219_s3 = int_to_ptr.vmem [resolvable:$true] %s218_s3 }
   0xd   :  { %311 = vmatpush3.bf16.msra.mxu1 %v310_v17  ;;  %s335_s4 = scalar_lea.vmem %s219_s3, 128  ;;  %p340_p1 = scmp.lt.s32.totalorder %s219_s3, %s219_s3 }
   0xe   :  { %312 = vmatprep.subr.bf16.mxu1 %v359_v3  ;;  %p336_p0 = scmp.ne.s32.totalorder %s219_s3, %s335_s4  ;;  %p341_p2 = scmp.lt.s32.totalorder %s335_s4, %s335_s4 }
  0x10   :  { %p342_p3 = por %p341_p2, %p340_p1 }
  0x11   :  { %314 = vmatpush3.bf16.msra.mxu1 %v313_v20 }
  0x12   :  { %315 = vmatprep.subr.bf16.mxu1 %v359_v3  ;;  %p343_p4 = pnand %p342_p3, %p336_p0 }
  0x15   :  { %317 = vmatpush3.bf16.msra.mxu1 %v316_v23 }
  0x16   :  { %318 = vmatprep.subr.bf16.mxu1 %v359_v3 }
  0x19   :  { %320 = vmatpush3.bf16.msra.mxu1 %v319_v26 }
  0x1a   :  { %321 = vmatprep.subr.bf16.mxu1 %v359_v3 }
  0x1d   :  { %323 = vmatpush3.bf16.msra.mxu1 %v322_v29 }
  0x1e   :  { %324 = vmatprep.subr.bf16.mxu1 %v359_v3 }
  0x21   :  { %326 = vmatpush3.bf16.msra.mxu1 %v325_v32 }
  0xde   :  { %v103_v34 = vpop.f32.mrb[0].mxu0 }
  0xdf   :  { %v104_v35 = vadd.f32 %v226_v33, %v103_v34  ;;  %v261_v36 = vpop.f32.mrb[1].mxu0 }
  0xe1   :  { %v107_v37 = vmax.f32 %v104_v35, 0.0 }
  0xe3   :  { %295 = vmatmul.mubr.f32.vlgmr.msra.gmra.mrb[0].mxu1 %v107_v37 }
 0x1b6   :  { %v197_v39 = vpop.f32.mrb[0].mxu1 }
 0x1b7   :  { %v198_v40 = vadd.f32 %v228_v38, %v197_v39  ;;  %v296_v41 = vpop.f32.mrb[1].mxu1 }
 0x1b9   :  { %201 = vmax.xlane.f32.xlu0 %v198_v40 }
 0x246   :  { %v202_v42 = vpop.xlane.xlu0 %201 }
 0x247   :  { %v203_v43 = vsub.f32 %v198_v40, %v202_v42 }
 0x249   :  { %v204_v44 = vmul.f32 1.442695, %v203_v43 }
 0x24b   :  { %331 = vpow2.f32 %v204_v44 }
 0x255   :  { %v332_v45 = vpop.eup %331 }
 0x256   :  { %206 = vadd.xlane.f32.xlu0 %v332_v45 }
 0x2e3   :  { %v207_v46 = vpop.xlane.xlu0 %206 }
 0x2e4   :  { %333 = vlog2.f32 %v207_v46 }
 0x2ee   :  { %v334_v47 = vpop.eup %333 }
 0x2ef   :  { %v209_v48 = vmul.f32 0.6931472, %v334_v47 }
 0x2f1   :  { %v210_v49 = vsub.f32 %v203_v43, %v209_v48 }
 0x2f3   :  { %211 = vst [vmem:[#allocation2] sm:$0xff] %v210_v49 }
 0x2f4   :  { %346 = shalt.err (!%p343_p4)
}
 0x2f5   :  { %s347_s13 = scalar_lea.hbm %s479_s5, 128 }
 0x2f6   :  { %p348_p5 = scmp.ne.s32.totalorder %s479_s5, %s347_s13  ;;  %p351_p6 = scmp.lt.u32.totalorder %s347_s13, %s479_s5 }
 0x2f8   :  { %p353_p7 = pnand %p351_p6, %p348_p5 }
 0x2fa   :  { %356 = shalt.err (!%p353_p7)
}
 0x2fb   :  { %221 = dma.vmem_to_hbm [thread:$0]  %s219_s3, 128, %s479_s5, [#allocation3]  }
 0x2fc   :  { %357 = dma.done.wait [#allocation3], 128  }
 0x2fd   :  { %358 = vsyncadd [#allocation3], 4294967168 }
 0x2fe   :  { %225 = vsyncpa [#allocation3], 1 }

</bundles_post_ra>
